<compile_context>
chip_gen: v7x
topology: tpu7x:2x2x1
jax: 0.10.0
libtpu: 0.0.40
codegen_flags: <defaults>
</compile_context>

<pallas_src>
from functools import partial

import numpy as np
import jax
import jax.numpy as jnp
from jax.experimental import pallas as pl
from jax.experimental.pallas import tpu as pltpu

_WS_EPS = 1e-5   # weight standardization eps (float32 path in the PyTorch module)
_GN_EPS = 1e-5   # nn.GroupNorm default eps


def _silu(v):
    # v * sigmoid(v), written with exp only (safe, portable lowering).
    return v / (1.0 + jnp.exp(-v))


def _standardize_weight(w):
    # w: (C_out, K) flattened conv weight; per-output-channel mean / population var.
    mu = jnp.mean(w, axis=-1, keepdims=True)
    var = jnp.mean((w - mu) ** 2, axis=-1, keepdims=True)
    return (w - mu) * jax.lax.rsqrt(var + _WS_EPS)


def _group_norm(h, gamma, beta, same, groups):
    # h: (C, HW).  Group aggregation is done with a tiny (C, C) membership matmul
    # (the MXU is otherwise idle here) so the kernel never reshapes / transposes the
    # (sublane=C, lane=HW) layout; stats reductions are plain lane reductions.
    c, hw = h.shape
    n = float((c // groups) * hw)
    gsum = jnp.dot(same, h, preferred_element_type=jnp.float32)       # (C, HW)
    mu = jnp.sum(gsum, axis=-1, keepdims=True) / n                    # (C, 1) group mean
    d = h - mu
    gsq = jnp.dot(same, d * d, preferred_element_type=jnp.float32)    # (C, HW)
    var = jnp.sum(gsq, axis=-1, keepdims=True) / n                    # (C, 1) group var
    return d * jax.lax.rsqrt(var + _GN_EPS) * gamma + beta


def _make_block1_kernel(groups):
    def kernel(patch_ref, w_ref, b_ref, g_ref, bb_ref, gmat_ref,
               temb_ref, wt_ref, bt_ref, out_ref):
        c_out = out_ref.shape[1]
        # Weight-standardized 3x3 conv as a single lane-dense MXU matmul.
        w_std = _standardize_weight(w_ref[...])                        # (C_out, 9*C_in)
        h = jnp.dot(w_std, patch_ref[0],
                    preferred_element_type=jnp.float32) + b_ref[...]   # (C_out, HW)
        # GroupNorm (affine).
        h = _group_norm(h, g_ref[...], bb_ref[...], gmat_ref[...], groups)
        # Fused time-MLP: Linear(SiLU(emb)); broadcast-multiply + lane reduce instead
        # of a narrow (N=1) matvec, producing a (2*C_out, 1) column directly.
        e = _silu(temb_ref[0])                                         # (1, T)
        t = jnp.sum(wt_ref[...] * e, axis=-1, keepdims=True) + bt_ref[...]  # (2*C_out, 1)
        scale = t[:c_out, :]
        shift = t[c_out:, :]
        h = h * (scale + 1.0) + shift
        out_ref[0] = _silu(h)
    return kernel


def _make_block2_kernel(groups):
    def kernel(patch_ref, w_ref, b_ref, g_ref, bb_ref, gmat_ref,
               xres_ref, wres_ref, bres_ref, out_ref):
        w_std = _standardize_weight(w_ref[...])                        # (C_out, 9*C_out)
        h = jnp.dot(w_std, patch_ref[0],
                    preferred_element_type=jnp.float32) + b_ref[...]
        h = _group_norm(h, g_ref[...], bb_ref[...], gmat_ref[...], groups)
        h = _silu(h)
        # Fused residual 1x1 conv + add.
        res = jnp.dot(wres_ref[...], xres_ref[0],
                      preferred_element_type=jnp.float32) + bres_ref[...]
        out_ref[0] = h + res
    return kernel


def _im2col_3x3(x_nchw):
    """(B, C, H, W) -> (B, C*9, H*W) patches for a stride-1, pad-1 3x3 conv.

    Plain-JAX layout plumbing so the Pallas kernels see the conv as one matmul.
    """
    b, c, h, w = x_nchw.shape
    xp = jnp.pad(x_nchw, ((0, 0), (0, 0), (1, 1), (1, 1)))
    cols = [xp[:, :, dy:dy + h, dx:dx + w] for dy in range(3) for dx in range(3)]
    patches = jnp.stack(cols, axis=2)                # (B, C, 9, H, W)
    return patches.reshape(b, c * 9, h * w)          # matches w.reshape(C_out, C*9)


@partial(jax.jit, static_argnames=("groups",))
def resnet_block_forward(x, time_emb, params, *, groups=8):
    """Pallas ResnetBlock forward.  x: (B, C_in, H, W) f32; time_emb: (B, T) f32."""
    b, c_in, h, w = x.shape
    hw = h * w
    c_out = params["w1"].shape[0]
    t_dim = time_emb.shape[1]

    # ---- layout plumbing (plain JAX) ----
    patches1 = _im2col_3x3(x)                         # (B, 9*C_in, HW)
    x_flat = x.reshape(b, c_in, hw).astype(jnp.float32)
    temb_row = time_emb.reshape(b, 1, t_dim).astype(jnp.float32)
    col = lambda v: v.reshape(-1, 1).astype(jnp.float32)

    w1 = params["w1"].reshape(c_out, c_in * 9)
    w2 = params["w2"].reshape(c_out, c_out * 9)
    if params.get("wres") is not None:                # 1x1 res conv
        wres = params["wres"].reshape(c_out, c_in)
        bres = col(params["bres"])
    else:                                             # res_conv == Identity (dim == dim_out)
        wres = jnp.eye(c_out, dtype=jnp.float32)
        bres = jnp.zeros((c_out, 1), jnp.float32)
    b1, g1, be1 = col(params["b1"]), col(params["g1"]), col(params["beta1"])
    b2, g2, be2 = col(params["b2"]), col(params["g2"]), col(params["beta2"])
    bt = col(params["bt"])
    wt = params["wt"].astype(jnp.float32)             # (2*C_out, T), PyTorch Linear layout

    # Constant group-membership matrix (C, C): same[i, j] = 1 iff same GroupNorm group.
    gid = np.arange(c_out) // (c_out // groups)
    same = jnp.asarray(gid[:, None] == gid[None, :], dtype=jnp.float32)

    cparams = pltpu.CompilerParams(dimension_semantics=("parallel",))
    full2 = lambda a: pl.BlockSpec(a.shape, lambda i: (0, 0))
    per_batch = lambda a: pl.BlockSpec((1,) + a.shape[1:], lambda i: (i, 0, 0))
    out_spec = pl.BlockSpec((1, c_out, hw), lambda i: (i, 0, 0))
    out_shape = jax.ShapeDtypeStruct((b, c_out, hw), jnp.float32)

    # ---- kernel 1: WS-conv3x3 -> GroupNorm -> time-MLP scale/shift -> SiLU ----
    h1 = pl.pallas_call(
        _make_block1_kernel(groups),
        out_shape=out_shape,
        grid=(b,),
        in_specs=[per_batch(patches1), full2(w1), full2(b1), full2(g1), full2(be1),
                  full2(same), per_batch(temb_row), full2(wt), full2(bt)],
        out_specs=out_spec,
        compiler_params=cparams,
    )(patches1, w1, b1, g1, be1, same, temb_row, wt, bt)

    # TODO(synk): at larger H*W, replace this wrapper-side im2col round trip with an
    # in-kernel halo / shifted-matmul conv so h1 never leaves VMEM between blocks.
    patches2 = _im2col_3x3(h1.reshape(b, c_out, h, w))   # (B, 9*C_out, HW)

    # ---- kernel 2: WS-conv3x3 -> GroupNorm -> SiLU, + fused 1x1 residual ----
    out = pl.pallas_call(
        _make_block2_kernel(groups),
        out_shape=out_shape,
        grid=(b,),
        in_specs=[per_batch(patches2), full2(w2), full2(b2), full2(g2), full2(be2),
                  full2(same), per_batch(x_flat), full2(wres), full2(bres)],
        out_specs=out_spec,
        compiler_params=cparams,
    )(patches2, w2, b2, g2, be2, same, x_flat, wres, bres)

    return out.reshape(b, c_out, h, w)


# ----------------------------- pure-JAX reference -----------------------------
def _reference_forward(x, time_emb, params, *, groups=8):
    hi = jax.lax.Precision.HIGHEST

    def ws_conv3x3(inp, wgt, bias):
        mu = jnp.mean(wgt, axis=(1, 2, 3), keepdims=True)
        var = jnp.mean((wgt - mu) ** 2, axis=(1, 2, 3), keepdims=True)
        wn = (wgt - mu) * jax.lax.rsqrt(var + _WS_EPS)
        y = jax.lax.conv_general_dilated(
            inp, wn, (1, 1), "SAME",
            dimension_numbers=("NCHW", "OIHW", "NCHW"), precision=hi)
        return y + bias[None, :, None, None]

    def group_norm(inp, gamma, beta):
        bb, cc, hh, ww = inp.shape
        xg = inp.reshape(bb, groups, cc // groups, hh, ww)
        mu = jnp.mean(xg, axis=(2, 3, 4), keepdims=True)
        var = jnp.mean((xg - mu) ** 2, axis=(2, 3, 4), keepdims=True)
        xn = ((xg - mu) * jax.lax.rsqrt(var + _GN_EPS)).reshape(bb, cc, hh, ww)
        return xn * gamma[None, :, None, None] + beta[None, :, None, None]

    t = jnp.dot(_silu(time_emb), params["wt"].T, precision=hi) + params["bt"]
    scale, shift = jnp.split(t, 2, axis=1)

    h = ws_conv3x3(x, params["w1"], params["b1"])
    h = group_norm(h, params["g1"], params["beta1"])
    h = h * (scale[:, :, None, None] + 1.0) + shift[:, :, None, None]
    h = _silu(h)

    h = ws_conv3x3(h, params["w2"], params["b2"])
    h = group_norm(h, params["g2"], params["beta2"])
    h = _silu(h)

    res = jax.lax.conv_general_dilated(
        x, params["wres"], (1, 1), "VALID",
        dimension_numbers=("NCHW", "OIHW", "NCHW"), precision=hi)
    res = res + params["bres"][None, :, None, None]
    return h + res


if __name__ == "__main__":
    B, C_IN, C_OUT, H, W = 2, 4, 16, 16, 16
    T_DIM, GROUPS = 32, 8
    f32 = jnp.float32

    ks = jax.random.split(jax.random.PRNGKey(0), 14)
    params = {
        "w1":    0.2 * jax.random.normal(ks[0], (C_OUT, C_IN, 3, 3), f32),
        "b1":    0.1 * jax.random.normal(ks[1], (C_OUT,), f32),
        "g1":    1.0 + 0.1 * jax.random.normal(ks[2], (C_OUT,), f32),
        "beta1": 0.1 * jax.random.normal(ks[3], (C_OUT,), f32),
        "w2":    0.2 * jax.random.normal(ks[4], (C_OUT, C_OUT, 3, 3), f32),
        "b2":    0.1 * jax.random.normal(ks[5], (C_OUT,), f32),
        "g2":    1.0 + 0.1 * jax.random.normal(ks[6], (C_OUT,), f32),
        "beta2": 0.1 * jax.random.normal(ks[7], (C_OUT,), f32),
        "wt":    0.2 * jax.random.normal(ks[8], (2 * C_OUT, T_DIM), f32),
        "bt":    0.1 * jax.random.normal(ks[9], (2 * C_OUT,), f32),
        "wres":  0.2 * jax.random.normal(ks[10], (C_OUT, C_IN, 1, 1), f32),
        "bres":  0.1 * jax.random.normal(ks[11], (C_OUT,), f32),
    }
    x = jax.random.normal(ks[12], (B, C_IN, H, W), f32)
    temb = jax.random.normal(ks[13], (B, T_DIM), f32)

    out = resnet_block_forward(x, temb, params, groups=GROUPS)
    out = jax.block_until_ready(out)

    ref = _reference_forward(x, temb, params, groups=GROUPS)
    assert out.shape == (B, C_OUT, H, W), out.shape
    max_err = float(jnp.max(jnp.abs(out - ref)))
    assert jnp.allclose(out, ref, atol=2e-2, rtol=2e-2), f"mismatch vs reference, max_err={max_err}"

    print("KERNEL_OK")
</pallas_src>

<mosaic_0001>
module attributes {stable_mosaic.version = 11 : i64} {
  func.func @kernel(%arg0: i32, %arg1: memref<1x36x256xf32, #tpu.memory_space<vmem>>, %arg2: memref<16x36xf32, #tpu.memory_space<vmem>>, %arg3: memref<16x1xf32, #tpu.memory_space<vmem>>, %arg4: memref<16x1xf32, #tpu.memory_space<vmem>>, %arg5: memref<16x1xf32, #tpu.memory_space<vmem>>, %arg6: memref<16x16xf32, #tpu.memory_space<vmem>>, %arg7: memref<1x1x32xf32, #tpu.memory_space<vmem>>, %arg8: memref<32x32xf32, #tpu.memory_space<vmem>>, %arg9: memref<32x1xf32, #tpu.memory_space<vmem>>, %arg10: memref<1x16x256xf32, #tpu.memory_space<vmem>>) attributes {dimension_semantics = [#tpu.dimension_semantics<parallel>], iteration_bounds = array<i64: 2>, scalar_prefetch = 0 : i64, scratch_operands = 0 : i64, tpu.core_type = #tpu.core_type<tc>, window_params = [{transform_indices = @transform_0, window_bounds = array<i64: 1, 36, 256>}, {pipeline_mode = #tpu.pipeline_mode<synchronous>, transform_indices = @transform_1, window_bounds = array<i64: 16, 36>}, {pipeline_mode = #tpu.pipeline_mode<synchronous>, transform_indices = @transform_2, window_bounds = array<i64: 16, 1>}, {pipeline_mode = #tpu.pipeline_mode<synchronous>, transform_indices = @transform_3, window_bounds = array<i64: 16, 1>}, {pipeline_mode = #tpu.pipeline_mode<synchronous>, transform_indices = @transform_4, window_bounds = array<i64: 16, 1>}, {pipeline_mode = #tpu.pipeline_mode<synchronous>, transform_indices = @transform_5, window_bounds = array<i64: 16, 16>}, {transform_indices = @transform_6, window_bounds = array<i64: 1, 1, 32>}, {pipeline_mode = #tpu.pipeline_mode<synchronous>, transform_indices = @transform_7, window_bounds = array<i64: 32, 32>}, {pipeline_mode = #tpu.pipeline_mode<synchronous>, transform_indices = @transform_8, window_bounds = array<i64: 32, 1>}, {transform_indices = @transform_9, window_bounds = array<i64: 1, 16, 256>}]} {
    %c0 = arith.constant 0 : index
    %c0_0 = arith.constant 0 : index
    %0 = vector.load %arg2[%c0, %c0_0] : memref<16x36xf32, #tpu.memory_space<vmem>>, vector<16x36xf32>
    %cst = arith.constant dense<0.000000e+00> : vector<16xf32>
    %1 = vector.multi_reduction <add>, %0, %cst [1] : vector<16x36xf32> to vector<16xf32>
    %2 = vector.shape_cast %1 : vector<16xf32> to vector<16x1xf32>
    %cst_1 = arith.constant 3.600000e+01 : f32
    %3 = vector.broadcast %cst_1 : f32 to vector<16x1xf32>
    %4 = arith.divf %2, %3 : vector<16x1xf32>
    %5 = vector.broadcast %4 : vector<16x1xf32> to vector<16x36xf32>
    %6 = arith.subf %0, %5 : vector<16x36xf32>
    %7 = arith.mulf %6, %6 : vector<16x36xf32>
    %cst_2 = arith.constant dense<0.000000e+00> : vector<16xf32>
    %8 = vector.multi_reduction <add>, %7, %cst_2 [1] : vector<16x36xf32> to vector<16xf32>
    %9 = vector.shape_cast %8 : vector<16xf32> to vector<16x1xf32>
    %cst_3 = arith.constant 3.600000e+01 : f32
    %10 = vector.broadcast %cst_3 : f32 to vector<16x1xf32>
    %11 = arith.divf %9, %10 : vector<16x1xf32>
    %12 = vector.broadcast %4 : vector<16x1xf32> to vector<16x36xf32>
    %13 = arith.subf %0, %12 : vector<16x36xf32>
    %cst_4 = arith.constant 9.99999974E-6 : f32
    %14 = vector.broadcast %cst_4 : f32 to vector<16x1xf32>
    %15 = arith.addf %11, %14 : vector<16x1xf32>
    %16 = math.rsqrt %15 : vector<16x1xf32>
    %17 = vector.broadcast %16 : vector<16x1xf32> to vector<16x36xf32>
    %18 = arith.mulf %13, %17 : vector<16x36xf32>
    %c0_5 = arith.constant 0 : index
    %c0_6 = arith.constant 0 : index
    %c0_7 = arith.constant 0 : index
    %19 = vector.load %arg1[%c0_5, %c0_6, %c0_7] : memref<1x36x256xf32, #tpu.memory_space<vmem>>, vector<1x36x256xf32>
    %20 = vector.shape_cast %19 : vector<1x36x256xf32> to vector<36x256xf32>
    %cst_8 = arith.constant dense<0.000000e+00> : vector<16x256xf32>
    %21 = tpu.matmul %18, %20, %cst_8 {dimension_numbers = #tpu.dot_dimension_numbers<[1], [0], [0], [1], [0, 0, 1, 1], [], []>} : vector<16x36xf32>, vector<36x256xf32>, vector<16x256xf32> -> vector<16x256xf32>
    %c0_9 = arith.constant 0 : index
    %c0_10 = arith.constant 0 : index
    %22 = vector.load %arg3[%c0_9, %c0_10] : memref<16x1xf32, #tpu.memory_space<vmem>>, vector<16x1xf32>
    %23 = vector.broadcast %22 : vector<16x1xf32> to vector<16x256xf32>
    %24 = arith.addf %21, %23 : vector<16x256xf32>
    %c0_11 = arith.constant 0 : index
    %c0_12 = arith.constant 0 : index
    %25 = vector.load %arg4[%c0_11, %c0_12] : memref<16x1xf32, #tpu.memory_space<vmem>>, vector<16x1xf32>
    %c0_13 = arith.constant 0 : index
    %c0_14 = arith.constant 0 : index
    %26 = vector.load %arg5[%c0_13, %c0_14] : memref<16x1xf32, #tpu.memory_space<vmem>>, vector<16x1xf32>
    %c0_15 = arith.constant 0 : index
    %c0_16 = arith.constant 0 : index
    %27 = vector.load %arg6[%c0_15, %c0_16] : memref<16x16xf32, #tpu.memory_space<vmem>>, vector<16x16xf32>
    %cst_17 = arith.constant dense<0.000000e+00> : vector<16x256xf32>
    %28 = tpu.matmul %27, %24, %cst_17 {dimension_numbers = #tpu.dot_dimension_numbers<[1], [0], [0], [1], [0, 0, 1, 1], [], []>} : vector<16x16xf32>, vector<16x256xf32>, vector<16x256xf32> -> vector<16x256xf32>
    %cst_18 = arith.constant dense<0.000000e+00> : vector<16xf32>
    %29 = vector.multi_reduction <add>, %28, %cst_18 [1] : vector<16x256xf32> to vector<16xf32>
    %30 = vector.shape_cast %29 : vector<16xf32> to vector<16x1xf32>
    %cst_19 = arith.constant 5.120000e+02 : f32
    %31 = vector.broadcast %cst_19 : f32 to vector<16x1xf32>
    %32 = arith.divf %30, %31 : vector<16x1xf32>
    %33 = vector.broadcast %32 : vector<16x1xf32> to vector<16x256xf32>
    %34 = arith.subf %24, %33 : vector<16x256xf32>
    %35 = arith.mulf %34, %34 : vector<16x256xf32>
    %cst_20 = arith.constant dense<0.000000e+00> : vector<16x256xf32>
    %36 = tpu.matmul %27, %35, %cst_20 {dimension_numbers = #tpu.dot_dimension_numbers<[1], [0], [0], [1], [0, 0, 1, 1], [], []>} : vector<16x16xf32>, vector<16x256xf32>, vector<16x256xf32> -> vector<16x256xf32>
    %cst_21 = arith.constant dense<0.000000e+00> : vector<16xf32>
    %37 = vector.multi_reduction <add>, %36, %cst_21 [1] : vector<16x256xf32> to vector<16xf32>
    %38 = vector.shape_cast %37 : vector<16xf32> to vector<16x1xf32>
    %cst_22 = arith.constant 5.120000e+02 : f32
    %39 = vector.broadcast %cst_22 : f32 to vector<16x1xf32>
    %40 = arith.divf %38, %39 : vector<16x1xf32>
    %cst_23 = arith.constant 9.99999974E-6 : f32
    %41 = vector.broadcast %cst_23 : f32 to vector<16x1xf32>
    %42 = arith.addf %40, %41 : vector<16x1xf32>
    %43 = math.rsqrt %42 : vector<16x1xf32>
    %44 = vector.broadcast %43 : vector<16x1xf32> to vector<16x256xf32>
    %45 = arith.mulf %34, %44 : vector<16x256xf32>
    %46 = vector.broadcast %25 : vector<16x1xf32> to vector<16x256xf32>
    %47 = arith.mulf %45, %46 : vector<16x256xf32>
    %48 = vector.broadcast %26 : vector<16x1xf32> to vector<16x256xf32>
    %49 = arith.addf %47, %48 : vector<16x256xf32>
    %c0_24 = arith.constant 0 : index
    %c0_25 = arith.constant 0 : index
    %c0_26 = arith.constant 0 : index
    %50 = vector.load %arg7[%c0_24, %c0_25, %c0_26] : memref<1x1x32xf32, #tpu.memory_space<vmem>>, vector<1x1x32xf32>
    %51 = vector.shape_cast %50 : vector<1x1x32xf32> to vector<1x32xf32>
    %cst_27 = arith.constant 0.000000e+00 : f32
    %52 = vector.broadcast %cst_27 : f32 to vector<1x32xf32>
    %53 = arith.subf %52, %51 : vector<1x32xf32>
    %54 = math.exp %53 : vector<1x32xf32>
    %cst_28 = arith.constant 1.000000e+00 : f32
    %55 = vector.broadcast %cst_28 : f32 to vector<1x32xf32>
    %56 = arith.addf %55, %54 : vector<1x32xf32>
    %57 = arith.divf %51, %56 : vector<1x32xf32>
    %c0_29 = arith.constant 0 : index
    %c0_30 = arith.constant 0 : index
    %58 = vector.load %arg8[%c0_29, %c0_30] : memref<32x32xf32, #tpu.memory_space<vmem>>, vector<32x32xf32>
    %59 = vector.broadcast %57 : vector<1x32xf32> to vector<32x32xf32>
    %60 = arith.mulf %58, %59 : vector<32x32xf32>
    %cst_31 = arith.constant dense<0.000000e+00> : vector<32xf32>
    %61 = vector.multi_reduction <add>, %60, %cst_31 [1] : vector<32x32xf32> to vector<32xf32>
    %62 = vector.shape_cast %61 : vector<32xf32> to vector<32x1xf32>
    %c0_32 = arith.constant 0 : index
    %c0_33 = arith.constant 0 : index
    %63 = vector.load %arg9[%c0_32, %c0_33] : memref<32x1xf32, #tpu.memory_space<vmem>>, vector<32x1xf32>
    %64 = arith.addf %62, %63 : vector<32x1xf32>
    %65 = vector.extract_strided_slice %64 {offsets = [0, 0], sizes = [16, 1], strides = [1, 1]} : vector<32x1xf32> to vector<16x1xf32>
    %66 = vector.extract_strided_slice %64 {offsets = [16, 0], sizes = [16, 1], strides = [1, 1]} : vector<32x1xf32> to vector<16x1xf32>
    %cst_34 = arith.constant 1.000000e+00 : f32
    %67 = vector.broadcast %cst_34 : f32 to vector<16x1xf32>
    %68 = arith.addf %65, %67 : vector<16x1xf32>
    %69 = vector.broadcast %68 : vector<16x1xf32> to vector<16x256xf32>
    %70 = arith.mulf %49, %69 : vector<16x256xf32>
    %71 = vector.broadcast %66 : vector<16x1xf32> to vector<16x256xf32>
    %72 = arith.addf %70, %71 : vector<16x256xf32>
    %cst_35 = arith.constant 0.000000e+00 : f32
    %73 = vector.broadcast %cst_35 : f32 to vector<16x256xf32>
    %74 = arith.subf %73, %72 : vector<16x256xf32>
    %75 = math.exp %74 : vector<16x256xf32>
    %cst_36 = arith.constant 1.000000e+00 : f32
    %76 = vector.broadcast %cst_36 : f32 to vector<16x256xf32>
    %77 = arith.addf %76, %75 : vector<16x256xf32>
    %78 = arith.divf %72, %77 : vector<16x256xf32>
    %c0_37 = arith.constant 0 : index
    %c0_38 = arith.constant 0 : index
    %c0_39 = arith.constant 0 : index
    %79 = vector.load %arg10[%c0_37, %c0_38, %c0_39] : memref<1x16x256xf32, #tpu.memory_space<vmem>>, vector<1x16x256xf32>
    %80 = vector.shape_cast %79 : vector<1x16x256xf32> to vector<16x256xf32>
    %81 = vector.shape_cast %78 : vector<16x256xf32> to vector<1x16x256xf32>
    tpu.vector_store %arg10[%c0_37, %c0_38, %c0_39], %81 {strides = array<i32>} : memref<1x16x256xf32, #tpu.memory_space<vmem>>, vector<1x16x256xf32>,
    return
  }
  func.func @transform_0(%arg0: i32) -> (i32, i32, i32) {
    %c0_i32 = arith.constant 0 : i32
    %c0_i32_0 = arith.constant 0 : i32
    %c0_i32_1 = arith.constant 0 : i32
    return %arg0, %c0_i32, %c0_i32_0 : i32, i32, i32
  }
  func.func @transform_1(%arg0: i32) -> (i32, i32) {
    %c0_i32 = arith.constant 0 : i32
    %c0_i32_0 = arith.constant 0 : i32
    %c0_i32_1 = arith.constant 0 : i32
    return %c0_i32, %c0_i32_0 : i32, i32
  }
  func.func @transform_2(%arg0: i32) -> (i32, i32) {
    %c0_i32 = arith.constant 0 : i32
    %c0_i32_0 = arith.constant 0 : i32
    %c0_i32_1 = arith.constant 0 : i32
    return %c0_i32, %c0_i32_0 : i32, i32
  }
  func.func @transform_3(%arg0: i32) -> (i32, i32) {
    %c0_i32 = arith.constant 0 : i32
    %c0_i32_0 = arith.constant 0 : i32
    %c0_i32_1 = arith.constant 0 : i32
    return %c0_i32, %c0_i32_0 : i32, i32
  }
  func.func @transform_4(%arg0: i32) -> (i32, i32) {
    %c0_i32 = arith.constant 0 : i32
    %c0_i32_0 = arith.constant 0 : i32
    %c0_i32_1 = arith.constant 0 : i32
    return %c0_i32, %c0_i32_0 : i32, i32
  }
  func.func @transform_5(%arg0: i32) -> (i32, i32) {
    %c0_i32 = arith.constant 0 : i32
    %c0_i32_0 = arith.constant 0 : i32
    %c0_i32_1 = arith.constant 0 : i32
    return %c0_i32, %c0_i32_0 : i32, i32
  }
  func.func @transform_6(%arg0: i32) -> (i32, i32, i32) {
    %c0_i32 = arith.constant 0 : i32
    %c0_i32_0 = arith.constant 0 : i32
    %c0_i32_1 = arith.constant 0 : i32
    return %arg0, %c0_i32, %c0_i32_0 : i32, i32, i32
  }
  func.func @transform_7(%arg0: i32) -> (i32, i32) {
    %c0_i32 = arith.constant 0 : i32
    %c0_i32_0 = arith.constant 0 : i32
    %c0_i32_1 = arith.constant 0 : i32
    return %c0_i32, %c0_i32_0 : i32, i32
  }
  func.func @transform_8(%arg0: i32) -> (i32, i32) {
    %c0_i32 = arith.constant 0 : i32
    %c0_i32_0 = arith.constant 0 : i32
    %c0_i32_1 = arith.constant 0 : i32
    return %c0_i32, %c0_i32_0 : i32, i32
  }
  func.func @transform_9(%arg0: i32) -> (i32, i32, i32) {
    %c0_i32 = arith.constant 0 : i32
    %c0_i32_0 = arith.constant 0 : i32
    %c0_i32_1 = arith.constant 0 : i32
    return %arg0, %c0_i32, %c0_i32_0 : i32, i32, i32
  }
}

module attributes {stable_mosaic.version = 11 : i64} {
  func.func @kernel(%arg0: i32, %arg1: memref<1x144x256xf32, #tpu.memory_space<vmem>>, %arg2: memref<16x144xf32, #tpu.memory_space<vmem>>, %arg3: memref<16x1xf32, #tpu.memory_space<vmem>>, %arg4: memref<16x1xf32, #tpu.memory_space<vmem>>, %arg5: memref<16x1xf32, #tpu.memory_space<vmem>>, %arg6: memref<16x16xf32, #tpu.memory_space<vmem>>, %arg7: memref<1x4x256xf32, #tpu.memory_space<vmem>>, %arg8: memref<16x4xf32, #tpu.memory_space<vmem>>, %arg9: memref<16x1xf32, #tpu.memory_space<vmem>>, %arg10: memref<1x16x256xf32, #tpu.memory_space<vmem>>) attributes {dimension_semantics = [#tpu.dimension_semantics<parallel>], iteration_bounds = array<i64: 2>, scalar_prefetch = 0 : i64, scratch_operands = 0 : i64, tpu.core_type = #tpu.core_type<tc>, window_params = [{transform_indices = @transform_0, window_bounds = array<i64: 1, 144, 256>}, {pipeline_mode = #tpu.pipeline_mode<synchronous>, transform_indices = @transform_1, window_bounds = array<i64: 16, 144>}, {pipeline_mode = #tpu.pipeline_mode<synchronous>, transform_indices = @transform_2, window_bounds = array<i64: 16, 1>}, {pipeline_mode = #tpu.pipeline_mode<synchronous>, transform_indices = @transform_3, window_bounds = array<i64: 16, 1>}, {pipeline_mode = #tpu.pipeline_mode<synchronous>, transform_indices = @transform_4, window_bounds = array<i64: 16, 1>}, {pipeline_mode = #tpu.pipeline_mode<synchronous>, transform_indices = @transform_5, window_bounds = array<i64: 16, 16>}, {transform_indices = @transform_6, window_bounds = array<i64: 1, 4, 256>}, {pipeline_mode = #tpu.pipeline_mode<synchronous>, transform_indices = @transform_7, window_bounds = array<i64: 16, 4>}, {pipeline_mode = #tpu.pipeline_mode<synchronous>, transform_indices = @transform_8, window_bounds = array<i64: 16, 1>}, {transform_indices = @transform_9, window_bounds = array<i64: 1, 16, 256>}]} {
    %c0 = arith.constant 0 : index
    %c0_0 = arith.constant 0 : index
    %0 = vector.load %arg2[%c0, %c0_0] : memref<16x144xf32, #tpu.memory_space<vmem>>, vector<16x144xf32>
    %cst = arith.constant dense<0.000000e+00> : vector<16xf32>
    %1 = vector.multi_reduction <add>, %0, %cst [1] : vector<16x144xf32> to vector<16xf32>
    %2 = vector.shape_cast %1 : vector<16xf32> to vector<16x1xf32>
    %cst_1 = arith.constant 1.440000e+02 : f32
    %3 = vector.broadcast %cst_1 : f32 to vector<16x1xf32>
    %4 = arith.divf %2, %3 : vector<16x1xf32>
    %5 = vector.broadcast %4 : vector<16x1xf32> to vector<16x144xf32>
    %6 = arith.subf %0, %5 : vector<16x144xf32>
    %7 = arith.mulf %6, %6 : vector<16x144xf32>
    %cst_2 = arith.constant dense<0.000000e+00> : vector<16xf32>
    %8 = vector.multi_reduction <add>, %7, %cst_2 [1] : vector<16x144xf32> to vector<16xf32>
    %9 = vector.shape_cast %8 : vector<16xf32> to vector<16x1xf32>
    %cst_3 = arith.constant 1.440000e+02 : f32
    %10 = vector.broadcast %cst_3 : f32 to vector<16x1xf32>
    %11 = arith.divf %9, %10 : vector<16x1xf32>
    %12 = vector.broadcast %4 : vector<16x1xf32> to vector<16x144xf32>
    %13 = arith.subf %0, %12 : vector<16x144xf32>
    %cst_4 = arith.constant 9.99999974E-6 : f32
    %14 = vector.broadcast %cst_4 : f32 to vector<16x1xf32>
    %15 = arith.addf %11, %14 : vector<16x1xf32>
    %16 = math.rsqrt %15 : vector<16x1xf32>
    %17 = vector.broadcast %16 : vector<16x1xf32> to vector<16x144xf32>
    %18 = arith.mulf %13, %17 : vector<16x144xf32>
    %c0_5 = arith.constant 0 : index
    %c0_6 = arith.constant 0 : index
    %c0_7 = arith.constant 0 : index
    %19 = vector.load %arg1[%c0_5, %c0_6, %c0_7] : memref<1x144x256xf32, #tpu.memory_space<vmem>>, vector<1x144x256xf32>
    %20 = vector.shape_cast %19 : vector<1x144x256xf32> to vector<144x256xf32>
    %cst_8 = arith.constant dense<0.000000e+00> : vector<16x256xf32>
    %21 = tpu.matmul %18, %20, %cst_8 {dimension_numbers = #tpu.dot_dimension_numbers<[1], [0], [0], [1], [0, 0, 1, 1], [], []>} : vector<16x144xf32>, vector<144x256xf32>, vector<16x256xf32> -> vector<16x256xf32>
    %c0_9 = arith.constant 0 : index
    %c0_10 = arith.constant 0 : index
    %22 = vector.load %arg3[%c0_9, %c0_10] : memref<16x1xf32, #tpu.memory_space<vmem>>, vector<16x1xf32>
    %23 = vector.broadcast %22 : vector<16x1xf32> to vector<16x256xf32>
    %24 = arith.addf %21, %23 : vector<16x256xf32>
    %c0_11 = arith.constant 0 : index
    %c0_12 = arith.constant 0 : index
    %25 = vector.load %arg4[%c0_11, %c0_12] : memref<16x1xf32, #tpu.memory_space<vmem>>, vector<16x1xf32>
    %c0_13 = arith.constant 0 : index
    %c0_14 = arith.constant 0 : index
    %26 = vector.load %arg5[%c0_13, %c0_14] : memref<16x1xf32, #tpu.memory_space<vmem>>, vector<16x1xf32>
    %c0_15 = arith.constant 0 : index
    %c0_16 = arith.constant 0 : index
    %27 = vector.load %arg6[%c0_15, %c0_16] : memref<16x16xf32, #tpu.memory_space<vmem>>, vector<16x16xf32>
    %cst_17 = arith.constant dense<0.000000e+00> : vector<16x256xf32>
    %28 = tpu.matmul %27, %24, %cst_17 {dimension_numbers = #tpu.dot_dimension_numbers<[1], [0], [0], [1], [0, 0, 1, 1], [], []>} : vector<16x16xf32>, vector<16x256xf32>, vector<16x256xf32> -> vector<16x256xf32>
    %cst_18 = arith.constant dense<0.000000e+00> : vector<16xf32>
    %29 = vector.multi_reduction <add>, %28, %cst_18 [1] : vector<16x256xf32> to vector<16xf32>
    %30 = vector.shape_cast %29 : vector<16xf32> to vector<16x1xf32>
    %cst_19 = arith.constant 5.120000e+02 : f32
    %31 = vector.broadcast %cst_19 : f32 to vector<16x1xf32>
    %32 = arith.divf %30, %31 : vector<16x1xf32>
    %33 = vector.broadcast %32 : vector<16x1xf32> to vector<16x256xf32>
    %34 = arith.subf %24, %33 : vector<16x256xf32>
    %35 = arith.mulf %34, %34 : vector<16x256xf32>
    %cst_20 = arith.constant dense<0.000000e+00> : vector<16x256xf32>
    %36 = tpu.matmul %27, %35, %cst_20 {dimension_numbers = #tpu.dot_dimension_numbers<[1], [0], [0], [1], [0, 0, 1, 1], [], []>} : vector<16x16xf32>, vector<16x256xf32>, vector<16x256xf32> -> vector<16x256xf32>
    %cst_21 = arith.constant dense<0.000000e+00> : vector<16xf32>
    %37 = vector.multi_reduction <add>, %36, %cst_21 [1] : vector<16x256xf32> to vector<16xf32>
    %38 = vector.shape_cast %37 : vector<16xf32> to vector<16x1xf32>
    %cst_22 = arith.constant 5.120000e+02 : f32
    %39 = vector.broadcast %cst_22 : f32 to vector<16x1xf32>
    %40 = arith.divf %38, %39 : vector<16x1xf32>
    %cst_23 = arith.constant 9.99999974E-6 : f32
    %41 = vector.broadcast %cst_23 : f32 to vector<16x1xf32>
    %42 = arith.addf %40, %41 : vector<16x1xf32>
    %43 = math.rsqrt %42 : vector<16x1xf32>
    %44 = vector.broadcast %43 : vector<16x1xf32> to vector<16x256xf32>
    %45 = arith.mulf %34, %44 : vector<16x256xf32>
    %46 = vector.broadcast %25 : vector<16x1xf32> to vector<16x256xf32>
    %47 = arith.mulf %45, %46 : vector<16x256xf32>
    %48 = vector.broadcast %26 : vector<16x1xf32> to vector<16x256xf32>
    %49 = arith.addf %47, %48 : vector<16x256xf32>
    %cst_24 = arith.constant 0.000000e+00 : f32
    %50 = vector.broadcast %cst_24 : f32 to vector<16x256xf32>
    %51 = arith.subf %50, %49 : vector<16x256xf32>
    %52 = math.exp %51 : vector<16x256xf32>
    %cst_25 = arith.constant 1.000000e+00 : f32
    %53 = vector.broadcast %cst_25 : f32 to vector<16x256xf32>
    %54 = arith.addf %53, %52 : vector<16x256xf32>
    %55 = arith.divf %49, %54 : vector<16x256xf32>
    %c0_26 = arith.constant 0 : index
    %c0_27 = arith.constant 0 : index
    %56 = vector.load %arg8[%c0_26, %c0_27] : memref<16x4xf32, #tpu.memory_space<vmem>>, vector<16x4xf32>
    %c0_28 = arith.constant 0 : index
    %c0_29 = arith.constant 0 : index
    %c0_30 = arith.constant 0 : index
    %57 = vector.load %arg7[%c0_28, %c0_29, %c0_30] : memref<1x4x256xf32, #tpu.memory_space<vmem>>, vector<1x4x256xf32>
    %58 = vector.shape_cast %57 : vector<1x4x256xf32> to vector<4x256xf32>
    %cst_31 = arith.constant dense<0.000000e+00> : vector<16x256xf32>
    %59 = tpu.matmul %56, %58, %cst_31 {dimension_numbers = #tpu.dot_dimension_numbers<[1], [0], [0], [1], [0, 0, 1, 1], [], []>} : vector<16x4xf32>, vector<4x256xf32>, vector<16x256xf32> -> vector<16x256xf32>
    %c0_32 = arith.constant 0 : index
    %c0_33 = arith.constant 0 : index
    %60 = vector.load %arg9[%c0_32, %c0_33] : memref<16x1xf32, #tpu.memory_space<vmem>>, vector<16x1xf32>
    %61 = vector.broadcast %60 : vector<16x1xf32> to vector<16x256xf32>
    %62 = arith.addf %59, %61 : vector<16x256xf32>
    %63 = arith.addf %55, %62 : vector<16x256xf32>
    %c0_34 = arith.constant 0 : index
    %c0_35 = arith.constant 0 : index
    %c0_36 = arith.constant 0 : index
    %64 = vector.load %arg10[%c0_34, %c0_35, %c0_36] : memref<1x16x256xf32, #tpu.memory_space<vmem>>, vector<1x16x256xf32>
    %65 = vector.shape_cast %64 : vector<1x16x256xf32> to vector<16x256xf32>
    %66 = vector.shape_cast %63 : vector<16x256xf32> to vector<1x16x256xf32>
    tpu.vector_store %arg10[%c0_34, %c0_35, %c0_36], %66 {strides = array<i32>} : memref<1x16x256xf32, #tpu.memory_space<vmem>>, vector<1x16x256xf32>,
    return
  }
  func.func @transform_0(%arg0: i32) -> (i32, i32, i32) {
    %c0_i32 = arith.constant 0 : i32
    %c0_i32_0 = arith.constant 0 : i32
    %c0_i32_1 = arith.constant 0 : i32
    return %arg0, %c0_i32, %c0_i32_0 : i32, i32, i32
  }
  func.func @transform_1(%arg0: i32) -> (i32, i32) {
    %c0_i32 = arith.constant 0 : i32
    %c0_i32_0 = arith.constant 0 : i32
    %c0_i32_1 = arith.constant 0 : i32
    return %c0_i32, %c0_i32_0 : i32, i32
  }
  func.func @transform_2(%arg0: i32) -> (i32, i32) {
    %c0_i32 = arith.constant 0 : i32
    %c0_i32_0 = arith.constant 0 : i32
    %c0_i32_1 = arith.constant 0 : i32
    return %c0_i32, %c0_i32_0 : i32, i32
  }
  func.func @transform_3(%arg0: i32) -> (i32, i32) {
    %c0_i32 = arith.constant 0 : i32
    %c0_i32_0 = arith.constant 0 : i32
    %c0_i32_1 = arith.constant 0 : i32
    return %c0_i32, %c0_i32_0 : i32, i32
  }
  func.func @transform_4(%arg0: i32) -> (i32, i32) {
    %c0_i32 = arith.constant 0 : i32
    %c0_i32_0 = arith.constant 0 : i32
    %c0_i32_1 = arith.constant 0 : i32
    return %c0_i32, %c0_i32_0 : i32, i32
  }
  func.func @transform_5(%arg0: i32) -> (i32, i32) {
    %c0_i32 = arith.constant 0 : i32
    %c0_i32_0 = arith.constant 0 : i32
    %c0_i32_1 = arith.constant 0 : i32
    return %c0_i32, %c0_i32_0 : i32, i32
  }
  func.func @transform_6(%arg0: i32) -> (i32, i32, i32) {
    %c0_i32 = arith.constant 0 : i32
    %c0_i32_0 = arith.constant 0 : i32
    %c0_i32_1 = arith.constant 0 : i32
    return %arg0, %c0_i32, %c0_i32_0 : i32, i32, i32
  }
  func.func @transform_7(%arg0: i32) -> (i32, i32) {
    %c0_i32 = arith.constant 0 : i32
    %c0_i32_0 = arith.constant 0 : i32
    %c0_i32_1 = arith.constant 0 : i32
    return %c0_i32, %c0_i32_0 : i32, i32
  }
  func.func @transform_8(%arg0: i32) -> (i32, i32) {
    %c0_i32 = arith.constant 0 : i32
    %c0_i32_0 = arith.constant 0 : i32
    %c0_i32_1 = arith.constant 0 : i32
    return %c0_i32, %c0_i32_0 : i32, i32
  }
  func.func @transform_9(%arg0: i32) -> (i32, i32, i32) {
    %c0_i32 = arith.constant 0 : i32
    %c0_i32_0 = arith.constant 0 : i32
    %c0_i32_1 = arith.constant 0 : i32
    return %arg0, %c0_i32, %c0_i32_0 : i32, i32, i32
  }
}

</mosaic_0001>

<bundles_post_ra>
// kernel: resnet_block_forward.2
= control target key start
LH: loop header
LB: loop body
LE: loop exit
PB: predicated region body
PF: predicated region fallthrough
CT: control target
= control target key end

     0   :  { %s1017_s30 = smov 0   ;;  %s1136_s0 = inlined_call_operand.vmem [shape: f32[2,36,256], index: 0, kind: input, shape index: {}]   ;;  %s1137_s1 = inlined_call_operand.vmem [shape: f32[16,36], index: 1, kind: input, shape index: {}]   ;;  %s1138_s2 = inlined_call_operand.vmem [shape: f32[16,1], index: 2, kind: input, shape index: {}]   ;;  %s1139_s3 = inlined_call_operand.vmem [shape: f32[16,1], index: 3, kind: input, shape index: {}]   ;;  %s1140_s4 = inlined_call_operand.vmem [shape: f32[16,1], index: 4, kind: input, shape index: {}]   ;;  %s1141_s5 = inlined_call_operand.vmem [shape: f32[16,16], index: 5, kind: input, shape index: {}]   ;;  %s1142_s6 = inlined_call_operand.vmem [shape: f32[2,1,32], index: 6, kind: input, shape index: {}]   ;;  %s1143_s7 = inlined_call_operand.vmem [shape: f32[32,32], index: 7, kind: input, shape index: {}]   ;;  %s1144_s8 = inlined_call_operand.vmem [shape: f32[32,1], index: 8, kind: input, shape index: {}]   ;;  %s1145_s9 = inlined_call_operand.vmem [shape: f32[2,16,256], index: 9, kind: output, shape index: {}]  }
   0x1 LB: > { %s881_s10 = sadd.s32 4294967295, %s963_s30   ;;  %p885_p0 = scmp.ge.s32.totalorder %s963_s30, 1  ;;  %s963_s30 = sphi %s1017_s30, %s19_s30  }
   0x2   : > { %p295_p1 = scmp.lt.s32.totalorder %s963_s30, 3 }
   0x4   : > { %p296_p2 = pnand %p885_p0, %p295_p1 }
   0x5   : > { %v347_v0 = vld [vmem:[%s1137_s1] sm:$0xff] (!%p296_p2)  ;;  %vm349_vm0 = vcmask (!%p296_p2), 293888   ;;  %v348_v1 = vld [vmem:[%s1137_s1 + $0x8] sm:$0xff] (!%p296_p2)  ;;  %p334_p3 = scmp.lt.s32.totalorder (!%p296_p2), %s881_s10, 1  ;;  %v965_v25 = vmov (!%p296_p2), 0.0   ;;  %vm405_vm1 = vcmask (!%p296_p2), 1043456   ;;  %v729_v61 = vlaneseq (!%p296_p2) }
   0x6   : > { %299 = sbr.rel (%p296_p2) target bundleno = 1331 (0x533), region = 56  ;;  %v350_v2 = vsel (!%p296_p2), %vm349_vm0, %v347_v0, 0.0  ;;  %v353_v3 = vsel (!%p296_p2), %vm349_vm0, %v348_v1, 0.0  ;;  %476 = vmatprep.mubr.f32.mxu0 (!%p296_p2), %v965_v25  ;;  %566 = vmatprep.mubr.f32.mxu1 (!%p296_p2), %v965_v25  ;;  %v387_v29 = vld [vmem:[%s1138_s2] sm:$0xff] (!%p296_p2)  ;;  %v388_v30 = vld [vmem:[%s1138_s2 + $0x8] sm:$0xff] (!%p296_p2)  ;;  %v966_v31 = vmov (!%p296_p2), 0  }
   0x7   : > { %351 = vadd.xlane.f32.xlu0 (!%p296_p2), %v350_v2  ;;  %928 = vset.pattern.permute.xlu1 (!%p296_p2), %v966_v31  ;;  %v1064_v54 = vld [vmem:[%s1141_s5] sm:$0xff] (!%p296_p2)  ;;  %vm495_vm2 = vcmask (!%p296_p2), 130048   ;;  %v1072_v55 = vld [vmem:[%s1141_s5 + $0x8] sm:$0xff] (!%p296_p2)  ;;  %v730_v62 = vshrl.u32 (!%p296_p2), %v729_v61, 7  ;;  %vm738_vm3 = vcmask (!%p296_p2), 261120  }
   0x8   : > { %927 = vset.pattern.permute.xlu0 (!%p296_p2), %v966_v31 }
   0xb   : > { %354 = vadd.xlane.f32.xlu0 (!%p296_p2), %v353_v3  ;;  %v724_v3 = vld [vmem:[%s1143_s7] sm:$0xff] (!%p296_p2) }
   0xd   : > { %s1147_s10 = smov (!%p334_p3, %s881_s10), 1 }
   0xe   : > { %s916_s15 = smul.u32 80, %s1147_s10  ;;  %s341_s29 = scalar_lea.vmem %s1142_s6, %s1147_s10 }
   0xf   : > { %v717_v56 = vld [vmem:[%s341_s29] sm:$0x1]  ;;  %s899_s16 = sshll.u32 %s1147_s10, 5 }
  0x10   : > { %s338_s18 = scalar_lea.vmem %s1136_s0, %s916_s15  ;;  %v718_v57 = vsub.f32 0.0, %v717_v56  ;;  %s346_s19 = scalar_lea.vmem %s1145_s9, %s899_s16 }
  0x11   : > { %v378_v14 = vld [vmem:[%s338_s18 + $0x8] sm:$0xff]  ;;  %v380_v15 = vld [vmem:[%s338_s18 + $0x18] sm:$0xff]  ;;  %v377_v17 = vld [vmem:[%s338_s18] sm:$0xff] }
  0x12   : > { %v900_v16 = vpack.c.bf16 %v380_v15, %v378_v14  ;;  %v379_v18 = vld [vmem:[%s338_s18 + $0x10] sm:$0xff]  ;;  %v382_v20 = vld [vmem:[%s338_s18 + $0x28] sm:$0xff]  ;;  %v384_v21 = vld [vmem:[%s338_s18 + $0x38] sm:$0xff]  ;;  %v719_v58 = vmul.f32 1.442695, %v718_v57 }
  0x13   : > { %v902_v19 = vpack.c.bf16 %v379_v18, %v377_v17  ;;  %v381_v22 = vld [vmem:[%s338_s18 + $0x20] sm:$0xff]  ;;  %v904_v23 = vpack.c.bf16 %v384_v21, %v382_v20  ;;  %v383_v24 = vld [vmem:[%s338_s18 + $0x30] sm:$0xff]  ;;  %v386_v27 = vld [vmem:[%s338_s18 + $0x48] sm:$0xf] }
  0x14   : > { %901 = vmatprep.subr.bf16.mxu0 %v900_v16  ;;  %v906_v26 = vpack.c.bf16 %v383_v24, %v381_v22  ;;  %v385_v28 = vld [vmem:[%s338_s18 + $0x40] sm:$0xf]  ;;  %v726_v14 = vld [vmem:[%s1143_s7 + $0x10] sm:$0xff]  ;;  %v727_v17 = vld [vmem:[%s1143_s7 + $0x18] sm:$0xff] }
  0x15   : > { %903 = vmatpush1.bf16.msra.mxu0 %v902_v19  ;;  %v489_v21 = vld [vmem:[%s1139_s3] sm:$0xff]  ;;  %v492_v22 = vld [vmem:[%s1140_s4 + $0x8] sm:$0xff] }
  0x16   : > { %905 = vmatprep.subr.bf16.mxu0 %v904_v23  ;;  %v490_v23 = vld [vmem:[%s1139_s3 + $0x8] sm:$0xff]  ;;  %v491_v24 = vld [vmem:[%s1140_s4] sm:$0xff] }
  0x19   : > { %907 = vmatpush1.bf16.msra.mxu0 %v906_v26 }
  0x1a   : > { %889 = vmatprep.subr.msk.mxu0 %vm405_vm1, %v386_v27 }
  0x1d   : > { %890 = vmatpush1.msk.msra.mxu0 %vm405_vm1, %v385_v28  ;;  %v751_v28 = vld [vmem:[%s1144_s8] sm:$0xff] }
  0x21   : > { %391 = vperm.xlu0 %927, %v387_v29  }
  0x94   : > { %v352_v4 = vpop.xlane.xlu0 %351 }
  0x95   : > { %v357_v5 = vmul.f32 0.027777778, %v352_v4 }
  0x97   : > { %v359_v6 = vsub.f32 %v347_v0, %v357_v5 }
  0x98   : > { %v355_v7 = vpop.xlane.xlu0 %354 }
  0x99   : > { %v358_v8 = vmul.f32 0.027777778, %v355_v7  ;;  %v361_v9 = vmul.f32 %v359_v6, %v359_v6 }
  0x9b   : > { %v360_v10 = vsub.f32 %v348_v1, %v358_v8  ;;  %v363_v11 = vsel %vm349_vm0, %v361_v9, 0.0  ;;  %v731_v1 = vsub.s32 0, %v730_v62  ;;  %v725_v8 = vld [vmem:[%s1143_s7 + $0x8] sm:$0xff] }
  0x9c   : > { %364 = vadd.xlane.f32.xlu1 %v363_v11 }
  0x9d   : > { %v362_v12 = vmul.f32 %v360_v10, %v360_v10 }
  0x9f   : > { %v366_v13 = vsel %vm349_vm0, %v362_v12, 0.0 }
  0xa0   : > { %367 = vadd.xlane.f32.xlu1 %v366_v13  ;;  %v392_v45 = vpop.permute.xlu0 %391 }
  0xb1   : > { %396 = vperm.xlu1 %928, %v388_v30  }
 0x129   : > { %v365_v32 = vpop.xlane.xlu1 %364 }
 0x12a   : > { %v369_v33 = vmul.f32 0.027777778, %v365_v32 }
 0x12c   : > { %v371_v34 = vadd.f32 1e-05, %v369_v33 }
 0x12d   : > { %v368_v35 = vpop.xlane.xlu1 %367 }
 0x12e   : > { %929 = vrsqrt.f32 %v371_v34  ;;  %v370_v36 = vmul.f32 0.027777778, %v368_v35  ;;  %v752_v35 = vld [vmem:[%s1144_s8 + $0x8] sm:$0xff] }
 0x130   : > { %v372_v37 = vadd.f32 1e-05, %v370_v36 }
 0x131   : > { %v397_v44 = vpop.permute.xlu1 %396 }
 0x132   : > { %931 = vrsqrt.f32 %v372_v37 }
 0x133   : > { %933 = vpow2.f32 %v719_v58 }
 0x138   : > { %v930_v38 = vpop.eup %929 }
 0x139   : > { %v375_v39 = vmul.f32 %v930_v38, %v359_v6 }
 0x13b   : > { %891 = vmatmul.mubr.msk.f32.vlgmr.msra.gmra.mrb[0].mxu0 %vm349_vm0, %v375_v39 }
 0x13c   : > { %v932_v40 = vpop.eup %931  ;;  %482 = vmatprep.mubr.f32.mxu0 %v965_v25 }
 0x13d   : > { %v376_v41 = vmul.f32 %v932_v40, %v360_v10  ;;  %v934_v59 = vpop.eup %933 }
 0x13e   : > { %v721_v60 = vadd.f32 1.0, %v934_v59 }
 0x13f   : > { %892 = vmatmul.mubr.msk.f32.gmra.mrb[2].mxu0 %vm349_vm0, %v376_v41 }
 0x140   : > { %935 = vrcp.f32 %v721_v60  ;;  %v753_v60 = vld [vmem:[%s1144_s8 + $0x10] sm:$0xff] }
 0x14a   : > { %v936_v63 = vpop.eup %935 }
 0x14b   : > { %v723_v0 = vmul.f32 %v936_v63, %v717_v56 }
 0x14d   : > { %v732_v2 = vrot.slane %v723_v0, %v731_v1 }
 0x14f   : > { %v734_v6 = vmul.f32 %v732_v2, %v724_v3  ;;  %v735_v12 = vmul.f32 %v732_v2, %v725_v8  ;;  %v736_v16 = vmul.f32 %v732_v2, %v726_v14  ;;  %v737_v19 = vmul.f32 %v732_v2, %v727_v17 }
 0x151   : > { %v739_v11 = vsel %vm738_vm3, %v734_v6, 0.0  ;;  %v742_v15 = vsel %vm738_vm3, %v735_v12, 0.0  ;;  %v745_v18 = vsel %vm738_vm3, %v736_v16, 0.0  ;;  %v748_v20 = vsel %vm738_vm3, %v737_v19, 0.0 }
 0x20e   : > { %v478_v42 = vpop.f32.mrb[0].mxu0 }
 0x20f   : > { %v480_v43 = vpop.f32.mrb[1].mxu0  ;;  %v479_v51 = vadd.f32 %v478_v42, %v392_v45 }
 0x210   : > { %v1054_v49 = vadd.f32 %v480_v43, %v392_v45 }
 0x212   : > { %v484_v46 = vpop.f32.mrb[2].mxu0 }
 0x213   : > { %v1052_v47 = vadd.f32 %v484_v46, %v397_v44  ;;  %v486_v48 = vpop.f32.mrb[3].mxu0 }
 0x214   : > { %v1056_v50 = vadd.f32 %v486_v48, %v397_v44 }
 0x215   : > { %v910_v53 = vpack.c.bf16 %v1052_v47, %v479_v51 }
 0x216   : > { %v908_v52 = vpack.c.bf16 %v1056_v50, %v1054_v49 }
 0x218   : > { %909 = vmatprep.subr.bf16.mxu1 %v908_v52 }
 0x219   : > { %911 = vmatpush1.bf16.msra.mxu1 %v910_v53 }
 0x21c   : > { %893 = vmatmul.mubr.msk.f32.vlgmr.msra.gmra.mrb[0].mxu1 %vm495_vm2, %v1064_v54 }
 0x21d   : > { %572 = vmatprep.mubr.f32.mxu1 %v965_v25 }
 0x220   : > { %894 = vmatmul.mubr.msk.f32.gmra.mrb[2].mxu1 %vm495_vm2, %v1072_v55 }
 0x221   : > { %660 = vmatprep.mubr.f32.mxu1 %v965_v25 }
 0x2ef   : > { %v568_v4 = vpop.f32.mrb[0].mxu1 }
 0x2f0   : > { %v570_v5 = vpop.f32.mrb[1].mxu1 }
 0x2f1   : > { %v579_v7 = vadd.f32 %v570_v5, %v568_v4 }
 0x2f3   : > { %580 = vadd.xlane.f32.xlu1 %v579_v7  ;;  %v574_v9 = vpop.f32.mrb[2].mxu1 }
 0x2f4   : > { %v576_v10 = vpop.f32.mrb[3].mxu1 }
 0x2f5   : > { %v582_v13 = vadd.f32 %v576_v10, %v574_v9 }
 0x2f7   : > { %740 = vadd.xlane.f32.xlu1 %v739_v11  ;;  %583 = vadd.xlane.f32.xlu0 %v582_v13 }
 0x2fb   : > { %743 = vadd.xlane.f32.xlu1 %v742_v15 }
 0x2ff   : > { %746 = vadd.xlane.f32.xlu1 %v745_v18 }
 0x303   : > { %749 = vadd.xlane.f32.xlu1 %v748_v20 }
 0x30d   : > { %691 = vperm.xlu0 %927, %v489_v21  }
 0x311   : > { %710 = vperm.xlu0 %927, %v492_v22  }
 0x314   : > { %696 = vperm.xlu1 %928, %v490_v23  }
 0x318   : > { %705 = vperm.xlu1 %928, %v491_v24  }
 0x380   : > { %v581_v26 = vpop.xlane.xlu1 %580 }
 0x381   : > { %v586_v27 = vmul.f32 0.001953125, %v581_v26 }
 0x383   : > { %v588_v29 = vsub.f32 %v479_v51, %v586_v27  ;;  %v589_v32 = vsub.f32 %v1054_v49, %v586_v27 }
 0x384   : > { %v741_v30 = vpop.xlane.xlu1 %740  ;;  %v584_v31 = vpop.xlane.xlu0 %583 }
 0x385   : > { %v755_v33 = vadd.f32 %v751_v28, %v741_v30  ;;  %v587_v34 = vmul.f32 0.001953125, %v584_v31  ;;  %v592_v39 = vmul.f32 %v588_v29, %v588_v29  ;;  %v593_v41 = vmul.f32 %v589_v32, %v589_v32 }
 0x387   : > { %v759_v36 = vadd.f32 1.0, %v755_v33  ;;  %v590_v37 = vsub.f32 %v1052_v47, %v587_v34  ;;  %v591_v38 = vsub.f32 %v1056_v50, %v587_v34  ;;  %v754_v47 = vld [vmem:[%s1144_s8 + $0x18] sm:$0xff] }
 0x388   : > { %v744_v40 = vpop.xlane.xlu1 %743 }
 0x389   : > { %v594_v42 = vmul.f32 %v590_v37, %v590_v37  ;;  %v595_v43 = vmul.f32 %v591_v38, %v591_v38  ;;  %v756_v44 = vadd.f32 %v752_v35, %v744_v40  ;;  %763 = vperm.xlu1 %928, %v759_v36  }
 0x38b   : > { %v914_v45 = vpack.c.bf16 %v594_v42, %v592_v39  ;;  %v760_v46 = vadd.f32 1.0, %v756_v44  ;;  %v912_v48 = vpack.c.bf16 %v595_v43, %v593_v41 }
 0x38c   : > { %v747_v49 = vpop.xlane.xlu1 %746  ;;  %v692_v4 = vpop.permute.xlu0 %691 }
 0x38d   : > { %768 = vperm.xlu0 %927, %v760_v46   ;;  %913 = vmatprep.subr.bf16.mxu1 %v912_v48  ;;  %v757_v61 = vadd.f32 %v753_v60, %v747_v49 }
 0x38e   : > { %915 = vmatpush1.bf16.msra.mxu1 %v914_v45 }
 0x390   : > { %v750_v51 = vpop.xlane.xlu1 %749  ;;  %v711_v11 = vpop.permute.xlu0 %710 }
 0x391   : > { %v758_v50 = vadd.f32 %v754_v47, %v750_v51  ;;  %895 = vmatmul.mubr.msk.f32.vlgmr.msra.gmra.mrb[4].mxu1 %vm495_vm2, %v1064_v54 }
 0x392   : > { %666 = vmatprep.mubr.f32.mxu1 %v965_v25 }
 0x393   : > { %782 = vperm.xlu0 %927, %v758_v50  }
 0x394   : > { %v697_v54 = vpop.permute.xlu1 %696 }
 0x395   : > { %896 = vmatmul.mubr.msk.f32.gmra.mrb[6].mxu1 %vm495_vm2, %v1072_v55 }
 0x398   : > { %v706_v25 = vpop.permute.xlu1 %705 }
 0x408   : > { %v764_v62 = vpop.permute.xlu1 %763 }
 0x40c   : > { %v769_v20 = vpop.permute.xlu0 %768 }
 0x412   : > { %v783_v31 = vpop.permute.xlu0 %782 }
 0x464   : > { %v662_v52 = vpop.f32.mrb[4].mxu1 }
 0x465   : > { %v664_v53 = vpop.f32.mrb[5].mxu1 }
 0x466   : > { %v673_v56 = vadd.f32 %v664_v53, %v662_v52 }
 0x468   : > { %674 = vadd.xlane.f32.xlu1 %v673_v56  ;;  %v668_v57 = vpop.f32.mrb[6].mxu1 }
 0x469   : > { %v670_v58 = vpop.f32.mrb[7].mxu1 }
 0x46a   : > { %v676_v59 = vadd.f32 %v670_v58, %v668_v57 }
 0x46c   : > { %677 = vadd.xlane.f32.xlu1 %v676_v59 }
 0x47d   : > { %777 = vperm.xlu1 %928, %v757_v61  }
 0x4f5   : > { %v675_v63 = vpop.xlane.xlu1 %674 }
 0x4f6   : > { %v679_v0 = vmul.f32 0.001953125, %v675_v63 }
 0x4f8   : > { %v681_v55 = vadd.f32 1e-05, %v679_v0 }
 0x4f9   : > { %v678_v1 = vpop.xlane.xlu1 %677 }
 0x4fa   : > { %937 = vrsqrt.f32 %v681_v55  ;;  %v680_v2 = vmul.f32 0.001953125, %v678_v1 }
 0x4fc   : > { %v682_v3 = vadd.f32 1e-05, %v680_v2 }
 0x4fd   : > { %v778_v21 = vpop.permute.xlu1 %777 }
 0x4fe   : > { %939 = vrsqrt.f32 %v682_v3 }
 0x504   : > { %v938_v5 = vpop.eup %937 }
 0x505   : > { %v685_v6 = vmul.f32 %v938_v5, %v588_v29  ;;  %v686_v7 = vmul.f32 %v938_v5, %v589_v32 }
 0x507   : > { %v699_v8 = vmul.f32 %v692_v4, %v685_v6  ;;  %v700_v9 = vmul.f32 %v692_v4, %v686_v7 }
 0x508   : > { %v940_v10 = vpop.eup %939 }
 0x509   : > { %v687_v12 = vmul.f32 %v940_v10, %v590_v37  ;;  %v688_v13 = vmul.f32 %v940_v10, %v591_v38  ;;  %v713_v14 = vadd.f32 %v706_v25, %v699_v8  ;;  %v714_v15 = vadd.f32 %v706_v25, %v700_v9 }
 0x50b   : > { %v701_v16 = vmul.f32 %v697_v54, %v687_v12  ;;  %v702_v17 = vmul.f32 %v697_v54, %v688_v13  ;;  %v771_v18 = vmul.f32 %v764_v62, %v713_v14  ;;  %v772_v19 = vmul.f32 %v764_v62, %v714_v15 }
 0x50d   : > { %v715_v22 = vadd.f32 %v711_v11, %v701_v16  ;;  %v716_v23 = vadd.f32 %v711_v11, %v702_v17  ;;  %v785_v24 = vadd.f32 %v778_v21, %v771_v18  ;;  %v786_v26 = vadd.f32 %v778_v21, %v772_v19 }
 0x50f   : > { %v773_v27 = vmul.f32 %v769_v20, %v715_v22  ;;  %v774_v28 = vmul.f32 %v769_v20, %v716_v23  ;;  %v789_v29 = vsub.f32 0.0, %v785_v24  ;;  %v790_v30 = vsub.f32 0.0, %v786_v26 }
 0x511   : > { %v787_v32 = vadd.f32 %v783_v31, %v773_v27  ;;  %v788_v33 = vadd.f32 %v783_v31, %v774_v28  ;;  %v793_v34 = vmul.f32 1.442695, %v789_v29  ;;  %v795_v35 = vmul.f32 1.442695, %v790_v30 }
 0x513   : > { %v791_v36 = vsub.f32 0.0, %v787_v32  ;;  %v792_v37 = vsub.f32 0.0, %v788_v33  ;;  %941 = vpow2.f32 %v793_v34 }
 0x514   : > { %943 = vpow2.f32 %v795_v35 }
 0x515   : > { %v797_v38 = vmul.f32 1.442695, %v791_v36  ;;  %v799_v39 = vmul.f32 1.442695, %v792_v37 }
 0x517   : > { %945 = vpow2.f32 %v797_v38 }
 0x518   : > { %947 = vpow2.f32 %v799_v39 }
 0x51d   : > { %v942_v40 = vpop.eup %941 }
 0x51e   : > { %v944_v41 = vpop.eup %943  ;;  %v801_v42 = vadd.f32 1.0, %v942_v40 }
 0x51f   : > { %v802_v43 = vadd.f32 1.0, %v944_v41 }
 0x520   : > { %949 = vrcp.f32 %v801_v42 }
 0x521   : > { %v946_v44 = vpop.eup %945  ;;  %951 = vrcp.f32 %v802_v43 }
 0x522   : > { %v948_v45 = vpop.eup %947  ;;  %v803_v46 = vadd.f32 1.0, %v946_v44 }
 0x523   : > { %v804_v48 = vadd.f32 1.0, %v948_v45 }
 0x524   : > { %953 = vrcp.f32 %v803_v46 }
 0x525   : > { %955 = vrcp.f32 %v804_v48 }
 0x52a   : > { %v950_v49 = vpop.eup %949 }
 0x52b   : > { %v952_v47 = vpop.eup %951  ;;  %v806_v51 = vmul.f32 %v950_v49, %v785_v24 }
 0x52c   : > { %v808_v50 = vmul.f32 %v952_v47, %v786_v26 }
 0x52d   : > { %813 = vst [vmem:[%s346_s19] sm:$0xff] %v806_v51 }
 0x52e   : > { %v954_v52 = vpop.eup %953  ;;  %814 = vst [vmem:[%s346_s19 + $0x8] sm:$0xff] %v808_v50 }
 0x52f   : > { %v956_v53 = vpop.eup %955  ;;  %v810_v56 = vmul.f32 %v954_v52, %v787_v32 }
 0x530   : > { %v812_v57 = vmul.f32 %v956_v53, %v788_v33 }
 0x531   : > { %815 = vst [vmem:[%s346_s19 + $0x10] sm:$0xff] %v810_v56 }
 0x532   : > { %816 = vst [vmem:[%s346_s19 + $0x18] sm:$0xff] %v812_v57 }
 0x533 PF: > { %s19_s30 = sadd.s32 1, %s963_s30  }
 0x534   : > { %p16_p4 = scmp.ge.s32.totalorder %s19_s30, 4  }
 0x536   :  { %18 = sbr.rel (!%p16_p4) target bundleno = 1 (0x1), region = 89 }

// kernel: resnet_block_forward.3
= control target key start
LH: loop header
LB: loop body
LE: loop exit
PB: predicated region body
PF: predicated region fallthrough
CT: control target
= control target key end

     0   :  { %s1124_s30 = smov 0   ;;  %s1277_s0 = inlined_call_operand.vmem [shape: f32[2,144,256], index: 0, kind: input, shape index: {}]   ;;  %s1278_s1 = inlined_call_operand.vmem [shape: f32[16,144], index: 1, kind: input, shape index: {}]   ;;  %s1279_s2 = inlined_call_operand.vmem [shape: f32[16,1], index: 2, kind: input, shape index: {}]   ;;  %s1280_s3 = inlined_call_operand.vmem [shape: f32[16,1], index: 3, kind: input, shape index: {}]   ;;  %s1281_s4 = inlined_call_operand.vmem [shape: f32[16,1], index: 4, kind: input, shape index: {}]   ;;  %s1282_s5 = inlined_call_operand.vmem [shape: f32[16,16], index: 5, kind: input, shape index: {}]   ;;  %s1283_s6 = inlined_call_operand.vmem [shape: f32[2,4,256], index: 6, kind: input, shape index: {}]   ;;  %s1284_s7 = inlined_call_operand.vmem [shape: f32[16,4], index: 7, kind: input, shape index: {}]   ;;  %s1285_s8 = inlined_call_operand.vmem [shape: f32[16,1], index: 8, kind: input, shape index: {}]   ;;  %s1286_s9 = inlined_call_operand.vmem [shape: f32[2,16,256], index: 9, kind: output, shape index: {}]  }
   0x1 LB: > { %s958_s10 = sadd.s32 4294967295, %s1070_s30   ;;  %p962_p0 = scmp.ge.s32.totalorder %s1070_s30, 1  ;;  %s1070_s30 = sphi %s1124_s30, %s19_s30  }
   0x2   : > { %p297_p1 = scmp.lt.s32.totalorder %s1070_s30, 3 }
   0x4   : > { %p298_p2 = pnand %p962_p0, %p297_p1 }
   0x5   : > { %v353_v0 = vld [vmem:[%s1278_s1] sm:$0xff] (!%p298_p2)  ;;  %v354_v1 = vld [vmem:[%s1278_s1 + $0x8] sm:$0xff] (!%p298_p2)  ;;  %vm357_vm0 = vcmask (!%p298_p2), 130048   ;;  %v355_v3 = vld [vmem:[%s1278_s1 + $0x10] sm:$0xff] (!%p298_p2)  ;;  %p338_p3 = scmp.lt.s32.totalorder (!%p298_p2), %s958_s10, 1  ;;  %vm801_vm1 = vcmask (!%p298_p2), 1043456  }
   0x6   : > { %301 = sbr.rel (%p298_p2) target bundleno = 1334 (0x536), region = 56  ;;  %v358_v2 = vsel (!%p298_p2), %vm357_vm0, %v354_v1, 0.0  ;;  %v356_v4 = vld [vmem:[%s1278_s1 + $0x18] sm:$0xff] (!%p298_p2)  ;;  %vm794_vm2 = vcmask (!%p298_p2), 31744  }
   0x7   : > { %v359_v5 = vadd.f32 (!%p298_p2), %v358_v2, %v353_v0  ;;  %v362_v6 = vsel (!%p298_p2), %vm357_vm0, %v356_v4, 0.0 }
   0x8   : > { %v363_v7 = vadd.f32 (!%p298_p2), %v362_v6, %v355_v3 }
   0x9   : > { %360 = vadd.xlane.f32.xlu0 (!%p298_p2), %v359_v5 }
   0xd   : > { %364 = vadd.xlane.f32.xlu0 %v363_v7  ;;  %s1288_s10 = smov (!%p338_p3, %s958_s10), 1 }
   0xe   : > { %s1026_s19 = smul.u32 288, %s1288_s10  ;;  %s980_s18 = sshll.u32 %s1288_s10, 3 }
   0xf   : > { %s347_s21 = scalar_lea.vmem %s1283_s6, %s980_s18  ;;  %s981_s13 = sshll.u32 %s1288_s10, 5 }
  0x10   : > { %s1152_s22 = scalar_lea.vmem %s1277_s0, %s1026_s19  ;;  %s352_s16 = scalar_lea.vmem %s1286_s9, %s981_s13 }
  0x11   : > { %v396_v8 = vld [vmem:[%s1152_s22 + $0x8] sm:$0xff]  ;;  %v398_v9 = vld [vmem:[%s1152_s22 + $0x18] sm:$0xff]  ;;  %v395_v10 = vld [vmem:[%s1152_s22] sm:$0xff] }
  0x12   : > { %v982_v11 = vpack.c.bf16 %v398_v9, %v396_v8  ;;  %v397_v12 = vld [vmem:[%s1152_s22 + $0x10] sm:$0xff]  ;;  %v400_v13 = vld [vmem:[%s1152_s22 + $0x28] sm:$0xff]  ;;  %v402_v14 = vld [vmem:[%s1152_s22 + $0x38] sm:$0xff] }
  0x13   : > { %v984_v15 = vpack.c.bf16 %v397_v12, %v395_v10  ;;  %v986_v16 = vpack.c.bf16 %v402_v14, %v400_v13  ;;  %v399_v17 = vld [vmem:[%s1152_s22 + $0x20] sm:$0xff]  ;;  %v401_v18 = vld [vmem:[%s1152_s22 + $0x30] sm:$0xff]  ;;  %v404_v19 = vld [vmem:[%s1152_s22 + $0x48] sm:$0xff] }
  0x14   : > { %983 = vmatprep.subr.bf16.mxu0 %v982_v11  ;;  %v406_v20 = vld [vmem:[%s1152_s22 + $0x58] sm:$0xff]  ;;  %v988_v21 = vpack.c.bf16 %v401_v18, %v399_v17  ;;  %v403_v23 = vld [vmem:[%s1152_s22 + $0x40] sm:$0xff]  ;;  %v405_v24 = vld [vmem:[%s1152_s22 + $0x50] sm:$0xff] }
  0x15   : > { %985 = vmatpush1.bf16.msra.mxu0 %v984_v15  ;;  %v990_v22 = vpack.c.bf16 %v406_v20, %v404_v19  ;;  %v408_v25 = vld [vmem:[%s1152_s22 + $0x68] sm:$0xff]  ;;  %v410_v26 = vld [vmem:[%s1152_s22 + $0x78] sm:$0xff]  ;;  %v992_v27 = vpack.c.bf16 %v405_v24, %v403_v23  ;;  %v407_v29 = vld [vmem:[%s1152_s22 + $0x60] sm:$0xff] }
  0x16   : > { %987 = vmatprep.subr.bf16.mxu0 %v986_v16  ;;  %v994_v28 = vpack.c.bf16 %v410_v26, %v408_v25  ;;  %v409_v30 = vld [vmem:[%s1152_s22 + $0x70] sm:$0xff]  ;;  %v412_v31 = vld [vmem:[%s1152_s22 + $0x88] sm:$0xff]  ;;  %v414_v32 = vld [vmem:[%s1152_s22 + $0x98] sm:$0xff]  ;;  %v1072_v16 = vmov 0  }
  0x17   : > { %v996_v33 = vpack.c.bf16 %v409_v30, %v407_v29  ;;  %v998_v34 = vpack.c.bf16 %v414_v32, %v412_v31  ;;  %v411_v51 = vld [vmem:[%s1152_s22 + $0x80] sm:$0xff]  ;;  %v413_v52 = vld [vmem:[%s1152_s22 + $0x90] sm:$0xff]  ;;  %v416_v54 = vld [vmem:[%s1152_s22 + $0xa8] sm:$0xff]  ;;  %1037 = vset.pattern.permute.xlu0 %v1072_v16  ;;  %1038 = vset.pattern.permute.xlu1 %v1072_v16  ;;  %v1073_v29 = vmov 0.0  }
  0x18   : > { %v1000_v53 = vpack.c.bf16 %v413_v52, %v411_v51  ;;  %v418_v55 = vld [vmem:[%s1152_s22 + $0xb8] sm:$0xff]  ;;  %v415_v57 = vld [vmem:[%s1152_s22 + $0xa0] sm:$0xff]  ;;  %v417_v58 = vld [vmem:[%s1152_s22 + $0xb0] sm:$0xff]  ;;  %602 = vmatprep.mubr.f32.mxu1 %v1073_v29 }
  0x19   : > { %989 = vmatpush1.bf16.msra.mxu0 %v988_v21  ;;  %v1002_v56 = vpack.c.bf16 %v418_v55, %v416_v54  ;;  %v1004_v59 = vpack.c.bf16 %v417_v58, %v415_v57  ;;  %v420_v60 = vld [vmem:[%s1152_s22 + $0xc8] sm:$0xff]  ;;  %v422_v61 = vld [vmem:[%s1152_s22 + $0xd8] sm:$0xff]  ;;  %v419_v63 = vld [vmem:[%s1152_s22 + $0xc0] sm:$0xff] }
  0x1a   : > { %991 = vmatprep.subr.bf16.mxu0 %v990_v22  ;;  %v1006_v62 = vpack.c.bf16 %v422_v61, %v420_v60  ;;  %v424_v2 = vld [vmem:[%s1152_s22 + $0xe8] sm:$0xff]  ;;  %v423_v5 = vld [vmem:[%s1152_s22 + $0xe0] sm:$0xff]  ;;  %v425_v6 = vld [vmem:[%s1152_s22 + $0xf0] sm:$0xff] }
  0x1b   : > { %v428_v7 = vld [vmem:[%s1152_s22 + $0x108] sm:$0xff]  ;;  %v1012_v8 = vpack.c.bf16 %v425_v6, %v423_v5  ;;  %v430_v9 = vld [vmem:[%s1152_s22 + $0x118] sm:$0xff]  ;;  %v427_v10 = vld [vmem:[%s1152_s22 + $0x100] sm:$0xff] }
  0x1c   : > { %v429_v11 = vld [vmem:[%s1152_s22 + $0x110] sm:$0xff]  ;;  %v1014_v12 = vpack.c.bf16 %v430_v9, %v428_v7  ;;  %v431_v14 = vld [vmem:[%s1279_s2] sm:$0xff]  ;;  %v432_v15 = vld [vmem:[%s1279_s2 + $0x8] sm:$0xff] }
  0x1d   : > { %993 = vmatpush1.bf16.msra.mxu0 %v992_v27  ;;  %v1016_v13 = vpack.c.bf16 %v429_v11, %v427_v10  ;;  %v528_v51 = vld [vmem:[%s1281_s4] sm:$0xff]  ;;  %v527_v52 = vld [vmem:[%s1280_s3 + $0x8] sm:$0xff] }
  0x1e   : > { %995 = vmatprep.subr.bf16.mxu0 %v994_v28  ;;  %v779_v61 = vld [vmem:[%s347_s21] sm:$0xff]  ;;  %v778_v6 = vld [vmem:[%s1284_s7 + $0x8] sm:$0xff] }
  0x1f   : > { %v777_v5 = vld [vmem:[%s1284_s7] sm:$0xff]  ;;  %v781_v16 = vld [vmem:[%s1285_s8 + $0x8] sm:$0xff] }
  0x21   : > { %997 = vmatpush1.bf16.msra.mxu0 %v996_v33 }
  0x22   : > { %999 = vmatprep.subr.bf16.mxu0 %v998_v34 }
  0x23   : > { %435 = vperm.xlu0 %1037, %v431_v14   ;;  %v780_v14 = vld [vmem:[%s1285_s8] sm:$0xff] }
  0x25   : > { %1001 = vmatpush1.bf16.msra.mxu0 %v1000_v53 }
  0x26   : > { %1003 = vmatprep.subr.bf16.mxu0 %v1002_v56 }
  0x29   : > { %1005 = vmatpush1.bf16.msra.mxu0 %v1004_v59 }
  0x2a   : > { %1007 = vmatprep.subr.bf16.mxu0 %v1006_v62 }
  0x96   : > { %v361_v35 = vpop.xlane.xlu0 %360 }
  0x97   : > { %v367_v36 = vmul.f32 0.0069444445, %v361_v35 }
  0x99   : > { %v1172_v37 = vsub.f32 %v353_v0, %v367_v36  ;;  %v1174_v38 = vsub.f32 %v354_v1, %v367_v36  ;;  %v421_v0 = vld [vmem:[%s1152_s22 + $0xd0] sm:$0xff] }
  0x9a   : > { %v365_v39 = vpop.xlane.xlu0 %364  ;;  %v1008_v1 = vpack.c.bf16 %v421_v0, %v419_v63 }
  0x9b   : > { %v368_v40 = vmul.f32 0.0069444445, %v365_v39  ;;  %v373_v41 = vmul.f32 %v1172_v37, %v1172_v37  ;;  %v374_v42 = vmul.f32 %v1174_v38, %v1174_v38 }
  0x9c   : > { %1009 = vmatpush1.bf16.msra.mxu0 %v1008_v1 }
  0x9d   : > { %v1180_v43 = vsub.f32 %v355_v3, %v368_v40  ;;  %v1182_v44 = vsub.f32 %v356_v4, %v368_v40  ;;  %v377_v45 = vsel %vm357_vm0, %v374_v42, 0.0  ;;  %v426_v3 = vld [vmem:[%s1152_s22 + $0xf8] sm:$0xff]  ;;  %v530_v42 = vld [vmem:[%s1282_s5] sm:$0xff] }
  0x9e   : > { %v378_v46 = vadd.f32 %v377_v45, %v373_v41  ;;  %v1010_v4 = vpack.c.bf16 %v426_v3, %v424_v2 }
  0x9f   : > { %v375_v47 = vmul.f32 %v1180_v43, %v1180_v43  ;;  %v376_v48 = vmul.f32 %v1182_v44, %v1182_v44 }
  0xa0   : > { %379 = vadd.xlane.f32.xlu1 %v378_v46  ;;  %1011 = vmatprep.subr.bf16.mxu0 %v1010_v4  ;;  %v793_v4 = vcombine.high %v779_v61, %v779_v61 }
  0xa1   : > { %v381_v49 = vsel %vm357_vm0, %v376_v48, 0.0  ;;  %1013 = vmatpush1.bf16.msra.mxu0 %v1012_v8 }
  0xa2   : > { %v382_v50 = vadd.f32 %v381_v49, %v375_v47  ;;  %1015 = vmatprep.subr.bf16.mxu0 %v1014_v12  ;;  %v436_v33 = vpop.permute.xlu0 %435 }
  0xa4   : > { %383 = vadd.xlane.f32.xlu1 %v382_v50  ;;  %v526_v50 = vld [vmem:[%s1280_s3] sm:$0xff] }
  0xa5   : > { %1017 = vmatpush1.bf16.msra.mxu0 %v1016_v13  ;;  %v529_v13 = vld [vmem:[%s1281_s4 + $0x8] sm:$0xff] }
  0xb5   : > { %440 = vperm.xlu1 %1038, %v432_v15  }
 0x12d   : > { %v380_v17 = vpop.xlane.xlu1 %379 }
 0x12e   : > { %v385_v18 = vmul.f32 0.0069444445, %v380_v17 }
 0x130   : > { %v387_v19 = vadd.f32 1e-05, %v385_v18 }
 0x131   : > { %v384_v20 = vpop.xlane.xlu1 %383 }
 0x132   : > { %1040 = vrsqrt.f32 %v387_v19  ;;  %v386_v21 = vmul.f32 0.0069444445, %v384_v20 }
 0x134   : > { %v388_v22 = vadd.f32 1e-05, %v386_v21 }
 0x135   : > { %v441_v32 = vpop.permute.xlu1 %440 }
 0x136   : > { %1042 = vrsqrt.f32 %v388_v22 }
 0x13c   : > { %v1041_v23 = vpop.eup %1040 }
 0x13d   : > { %v392_v24 = vmul.f32 %v1041_v23, %v1174_v38  ;;  %v391_v25 = vmul.f32 %v1041_v23, %v1172_v37 }
 0x13f   : > { %968 = vmatprep.mubr.msk.f32.mxu0 %vm357_vm0, %v392_v24 }
 0x140   : > { %v1043_v26 = vpop.eup %1042  ;;  %514 = vmatmul.mubr.f32.vlgmr.msra.gmra.mrb[0].mxu0 %v391_v25 }
 0x141   : > { %v394_v27 = vmul.f32 %v1043_v26, %v1182_v44  ;;  %v393_v28 = vmul.f32 %v1043_v26, %v1180_v43  ;;  %v531_v43 = vld [vmem:[%s1282_s5 + $0x8] sm:$0xff] }
 0x143   : > { %969 = vmatprep.mubr.msk.f32.mxu0 %vm357_vm0, %v394_v27 }
 0x144   : > { %520 = vmatmul.mubr.f32.gmra.mrb[2].mxu0 %v393_v28 }
 0x213   : > { %v515_v30 = vpop.f32.mrb[0].mxu0 }
 0x214   : > { %v517_v31 = vpop.f32.mrb[1].mxu0  ;;  %v516_v39 = vadd.f32 %v515_v30, %v436_v33 }
 0x215   : > { %v518_v37 = vadd.f32 %v517_v31, %v436_v33 }
 0x217   : > { %v521_v34 = vpop.f32.mrb[2].mxu0 }
 0x218   : > { %v522_v35 = vadd.f32 %v521_v34, %v441_v32  ;;  %v523_v36 = vpop.f32.mrb[3].mxu0 }
 0x219   : > { %v524_v38 = vadd.f32 %v523_v36, %v441_v32 }
 0x21a   : > { %v1020_v41 = vpack.c.bf16 %v522_v35, %v516_v39 }
 0x21b   : > { %v1018_v40 = vpack.c.bf16 %v524_v38, %v518_v37 }
 0x21d   : > { %1019 = vmatprep.subr.bf16.mxu1 %v1018_v40 }
 0x21e   : > { %1021 = vmatpush1.bf16.msra.mxu1 %v1020_v41 }
 0x221   : > { %970 = vmatmul.mubr.msk.f32.vlgmr.msra.gmra.mrb[0].mxu1 %vm357_vm0, %v530_v42 }
 0x222   : > { %608 = vmatprep.mubr.f32.mxu1 %v1073_v29 }
 0x225   : > { %971 = vmatmul.mubr.msk.f32.gmra.mrb[2].mxu1 %vm357_vm0, %v531_v43 }
 0x226   : > { %696 = vmatprep.mubr.f32.mxu1 %v1073_v29 }
 0x2f4   : > { %v604_v44 = vpop.f32.mrb[0].mxu1 }
 0x2f5   : > { %v606_v45 = vpop.f32.mrb[1].mxu1 }
 0x2f6   : > { %v615_v46 = vadd.f32 %v606_v45, %v604_v44 }
 0x2f8   : > { %616 = vadd.xlane.f32.xlu1 %v615_v46  ;;  %v610_v47 = vpop.f32.mrb[2].mxu1 }
 0x2f9   : > { %v612_v48 = vpop.f32.mrb[3].mxu1 }
 0x2fa   : > { %v618_v49 = vadd.f32 %v612_v48, %v610_v47 }
 0x2fc   : > { %619 = vadd.xlane.f32.xlu0 %v618_v49 }
 0x309   : > { %727 = vperm.xlu1 %1038, %v526_v50  }
 0x30d   : > { %741 = vperm.xlu1 %1038, %v528_v51  }
 0x312   : > { %732 = vperm.xlu0 %1037, %v527_v52  }
 0x385   : > { %v617_v53 = vpop.xlane.xlu1 %616 }
 0x386   : > { %v622_v54 = vmul.f32 0.001953125, %v617_v53 }
 0x388   : > { %v624_v56 = vsub.f32 %v516_v39, %v622_v54  ;;  %v625_v57 = vsub.f32 %v518_v37, %v622_v54 }
 0x389   : > { %v620_v55 = vpop.xlane.xlu0 %619  ;;  %v728_v20 = vpop.permute.xlu1 %727 }
 0x38a   : > { %v623_v58 = vmul.f32 0.001953125, %v620_v55  ;;  %v628_v62 = vmul.f32 %v624_v56, %v624_v56  ;;  %v629_v63 = vmul.f32 %v625_v57, %v625_v57 }
 0x38c   : > { %v626_v59 = vsub.f32 %v522_v35, %v623_v58  ;;  %v627_v60 = vsub.f32 %v524_v38, %v623_v58 }
 0x38d   : > { %v742_v21 = vpop.permute.xlu1 %741 }
 0x38e   : > { %v630_v0 = vmul.f32 %v626_v59, %v626_v59  ;;  %v631_v1 = vmul.f32 %v627_v60, %v627_v60 }
 0x390   : > { %v1024_v2 = vpack.c.bf16 %v630_v0, %v628_v62  ;;  %v1022_v3 = vpack.c.bf16 %v631_v1, %v629_v63 }
 0x391   : > { %v733_v38 = vpop.permute.xlu0 %732 }
 0x392   : > { %1023 = vmatprep.subr.bf16.mxu1 %v1022_v3 }
 0x393   : > { %1025 = vmatpush1.bf16.msra.mxu1 %v1024_v2 }
 0x394   : > { %974 = vmatprep.subr.msk.mxu1 %vm801_vm1, %v793_v4 }
 0x396   : > { %972 = vmatmul.mubr.msk.f32.vlgmr.msra.gmra.mrb[4].mxu1 %vm357_vm0, %v530_v42 }
 0x397   : > { %702 = vmatprep.mubr.f32.mxu1 %v1073_v29  ;;  %975 = vmatpush1.msk.msra.mxu1 %vm801_vm1, %v779_v61 }
 0x39a   : > { %973 = vmatmul.mubr.msk.f32.gmra.mrb[6].mxu1 %vm357_vm0, %v531_v43 }
 0x39b   : > { %870 = vmatprep.mubr.f32.mxu1 %v1073_v29 }
 0x39e   : > { %976 = vmatmul.mubr.msk.f32.vlgmr.msra.gmra.mrb[8].mxu1 %vm794_vm2, %v777_v5 }
 0x39f   : > { %876 = vmatprep.mubr.f32.mxu1 %v1073_v29 }
 0x3a2   : > { %977 = vmatmul.mubr.msk.f32.gmra.mrb[10].mxu1 %vm794_vm2, %v778_v6 }
 0x469   : > { %v698_v7 = vpop.f32.mrb[4].mxu1 }
 0x46a   : > { %v700_v8 = vpop.f32.mrb[5].mxu1 }
 0x46b   : > { %v709_v9 = vadd.f32 %v700_v8, %v698_v7 }
 0x46d   : > { %710 = vadd.xlane.f32.xlu1 %v709_v9  ;;  %v704_v10 = vpop.f32.mrb[6].mxu1 }
 0x46e   : > { %v706_v11 = vpop.f32.mrb[7].mxu1 }
 0x46f   : > { %v712_v12 = vadd.f32 %v706_v11, %v704_v10 }
 0x471   : > { %713 = vadd.xlane.f32.xlu1 %v712_v12  ;;  %v872_v15 = vpop.f32.mrb[8].mxu1 }
 0x472   : > { %v874_v17 = vpop.f32.mrb[9].mxu1 }
 0x475   : > { %v1264_v18 = vpop.f32.mrb[10].mxu1 }
 0x476   : > { %v1266_v19 = vpop.f32.mrb[11].mxu1 }
 0x482   : > { %746 = vperm.xlu1 %1038, %v529_v13  }
 0x486   : > { %784 = vperm.xlu1 %1038, %v780_v14  }
 0x48a   : > { %789 = vperm.xlu1 %1038, %v781_v16  }
 0x4fa   : > { %v711_v22 = vpop.xlane.xlu1 %710 }
 0x4fb   : > { %v715_v23 = vmul.f32 0.001953125, %v711_v22 }
 0x4fd   : > { %v717_v24 = vadd.f32 1e-05, %v715_v23 }
 0x4fe   : > { %v714_v25 = vpop.xlane.xlu1 %713 }
 0x4ff   : > { %1044 = vrsqrt.f32 %v717_v24  ;;  %v716_v26 = vmul.f32 0.001953125, %v714_v25 }
 0x501   : > { %v718_v27 = vadd.f32 1e-05, %v716_v26 }
 0x502   : > { %v747_v43 = vpop.permute.xlu1 %746 }
 0x503   : > { %1046 = vrsqrt.f32 %v718_v27 }
 0x509   : > { %v1045_v28 = vpop.eup %1044 }
 0x50a   : > { %v721_v29 = vmul.f32 %v1045_v28, %v624_v56  ;;  %v722_v30 = vmul.f32 %v1045_v28, %v625_v57 }
 0x50c   : > { %v735_v31 = vmul.f32 %v728_v20, %v721_v29  ;;  %v736_v32 = vmul.f32 %v728_v20, %v722_v30 }
 0x50d   : > { %v1047_v33 = vpop.eup %1046 }
 0x50e   : > { %v723_v34 = vmul.f32 %v1047_v33, %v626_v59  ;;  %v724_v35 = vmul.f32 %v1047_v33, %v627_v60  ;;  %v749_v36 = vadd.f32 %v742_v21, %v735_v31  ;;  %v750_v37 = vadd.f32 %v742_v21, %v736_v32  ;;  %v785_v60 = vpop.permute.xlu1 %784 }
 0x50f   : > { %v873_v0 = vadd.f32 %v872_v15, %v785_v60  ;;  %v875_v2 = vadd.f32 %v874_v17, %v785_v60 }
 0x510   : > { %v737_v39 = vmul.f32 %v733_v38, %v723_v34  ;;  %v738_v40 = vmul.f32 %v733_v38, %v724_v35  ;;  %v753_v41 = vsub.f32 0.0, %v749_v36  ;;  %v754_v42 = vsub.f32 0.0, %v750_v37 }
 0x512   : > { %v751_v44 = vadd.f32 %v747_v43, %v737_v39  ;;  %v752_v45 = vadd.f32 %v747_v43, %v738_v40  ;;  %v757_v46 = vmul.f32 1.442695, %v753_v41  ;;  %v759_v47 = vmul.f32 1.442695, %v754_v42  ;;  %v790_v3 = vpop.permute.xlu1 %789 }
 0x513   : > { %v879_v9 = vadd.f32 %v1264_v18, %v790_v3  ;;  %v881_v11 = vadd.f32 %v1266_v19, %v790_v3 }
 0x514   : > { %v755_v48 = vsub.f32 0.0, %v751_v44  ;;  %v756_v49 = vsub.f32 0.0, %v752_v45  ;;  %1048 = vpow2.f32 %v757_v46 }
 0x515   : > { %1050 = vpow2.f32 %v759_v47 }
 0x516   : > { %v761_v50 = vmul.f32 1.442695, %v755_v48  ;;  %v763_v51 = vmul.f32 1.442695, %v756_v49 }
 0x518   : > { %1052 = vpow2.f32 %v761_v50 }
 0x519   : > { %1054 = vpow2.f32 %v763_v51 }
 0x51e   : > { %v1049_v52 = vpop.eup %1048 }
 0x51f   : > { %v1051_v53 = vpop.eup %1050  ;;  %v765_v54 = vadd.f32 1.0, %v1049_v52 }
 0x520   : > { %v766_v55 = vadd.f32 1.0, %v1051_v53 }
 0x521   : > { %1056 = vrcp.f32 %v765_v54 }
 0x522   : > { %v1053_v56 = vpop.eup %1052  ;;  %1058 = vrcp.f32 %v766_v55 }
 0x523   : > { %v1055_v57 = vpop.eup %1054  ;;  %v767_v58 = vadd.f32 1.0, %v1053_v56 }
 0x524   : > { %v768_v59 = vadd.f32 1.0, %v1055_v57 }
 0x525   : > { %1060 = vrcp.f32 %v767_v58 }
 0x526   : > { %1062 = vrcp.f32 %v768_v59 }
 0x52b   : > { %v1057_v61 = vpop.eup %1056 }
 0x52c   : > { %v1059_v62 = vpop.eup %1058  ;;  %v770_v63 = vmul.f32 %v1057_v61, %v749_v36 }
 0x52d   : > { %v772_v1 = vmul.f32 %v1059_v62, %v750_v37 }
 0x52e   : > { %v883_v4 = vadd.f32 %v873_v0, %v770_v63 }
 0x52f   : > { %v1061_v5 = vpop.eup %1060  ;;  %v884_v6 = vadd.f32 %v875_v2, %v772_v1 }
 0x530   : > { %v1063_v7 = vpop.eup %1062  ;;  %v774_v8 = vmul.f32 %v1061_v5, %v751_v44  ;;  %887 = vst [vmem:[%s352_s16] sm:$0xff] %v883_v4 }
 0x531   : > { %v776_v10 = vmul.f32 %v1063_v7, %v752_v45  ;;  %888 = vst [vmem:[%s352_s16 + $0x8] sm:$0xff] %v884_v6 }
 0x532   : > { %v885_v12 = vadd.f32 %v879_v9, %v774_v8 }
 0x533   : > { %v886_v13 = vadd.f32 %v881_v11, %v776_v10 }
 0x534   : > { %889 = vst [vmem:[%s352_s16 + $0x10] sm:$0xff] %v885_v12 }
 0x535   : > { %890 = vst [vmem:[%s352_s16 + $0x18] sm:$0xff] %v886_v13 }
 0x536 PF: > { %s19_s30 = sadd.s32 1, %s1070_s30  }
 0x537   : > { %p16_p4 = scmp.ge.s32.totalorder %s19_s30, 4  }
 0x539   :  { %18 = sbr.rel (!%p16_p4) target bundleno = 1 (0x1), region = 89 }

</bundles_post_ra>
